<compile_context>
chip_gen: v5e
topology: v5e:2x2
jax: 0.10.0
libtpu: 0.0.40
codegen_flags: <defaults>
</compile_context>

<pallas_src>
import functools

import jax
import jax.numpy as jnp
from jax.experimental import pallas as pl
from jax.experimental.pallas import tpu as pltpu

_DMA_RING = 8  # max in-flight row-gather DMAs per grid step (review: 4-8)


def _round_up(x, m):
    return (x + m - 1) // m * m


def _sublane_multiple(dtype):
    # Native (8, 128) tile is for 32-bit; sub-32-bit dtypes pack along sublanes.
    return max(8, 32 // jnp.dtype(dtype).itemsize)


def _embed_gather_kernel(idx_ref, w_hbm, out_ref, sems):
    """Gather `tb` table rows (HBM) into one (tb, D) VMEM output block.

    idx_ref: (NT_pad,) int32 token ids in SMEM (scalar prefetched).
    w_hbm:   (V, D) embedding table, left in HBM (memory_space=pl.ANY).
    out_ref: (tb, D) output block for this grid step (pipelined to HBM).
    sems:    (_DMA_RING,) DMA semaphores bounding in-flight row copies.
    """
    tb = out_ref.shape[0]
    base = pl.program_id(0) * tb

    def row_copy(i, tok):
        # One (1, D) row: HBM row `tok` -> output row `i`.  Wait descriptors
        # only need matching shape + semaphore, so waits pass tok=0.
        return pltpu.make_async_copy(
            w_hbm.at[pl.ds(tok, 1), :],
            out_ref.at[pl.ds(i, 1), :],
            sems.at[i % _DMA_RING],
        )

    def start_row(i):
        row_copy(i, idx_ref[base + i]).start()

    lead = min(_DMA_RING, tb)

    @pl.loop(0, lead)
    def _(i):                       # prologue: fill the DMA ring
        start_row(i)

    @pl.loop(0, tb - lead)
    def _(i):                       # steady state: retire slot, reuse it
        row_copy(i, 0).wait()
        start_row(i + lead)

    @pl.loop(tb - lead, tb)
    def _(i):                       # epilogue: drain — every row has landed
        row_copy(i, 0).wait()       # before Pallas writes this block to HBM


@functools.partial(jax.jit, static_argnames=("tokens_per_block",))
def word_embedding_pallas(x, w_embed, *, tokens_per_block=512):
    """out = w_embed[x].  x: (N, T) int in [0, V); w_embed: (V, D) -> (N, T, D)."""
    N, T = x.shape
    V, D = w_embed.shape
    NT = N * T
    dtype = w_embed.dtype
    itemsize = jnp.dtype(dtype).itemsize

    sub = _sublane_multiple(dtype)
    tb = min(_round_up(tokens_per_block, sub), _round_up(NT, sub))
    NT_pad = _round_up(NT, tb)

    # PyTorch would raise on out-of-range indices; Pallas performs no runtime
    # OOB check on DMA sources, so clamp defensively (exact for valid inputs).
    idx = jnp.clip(x.reshape(NT).astype(jnp.int32), 0, V - 1)
    if NT_pad != NT:
        idx = jnp.pad(idx, (0, NT_pad - NT))  # padded slots gather row 0

    cost = pl.CostEstimate(
        flops=0,
        transcendentals=0,
        bytes_accessed=2 * NT_pad * D * itemsize + NT_pad * 4,
    )

    out = pl.pallas_call(
        _embed_gather_kernel,
        out_shape=jax.ShapeDtypeStruct((NT_pad, D), dtype),
        grid_spec=pltpu.PrefetchScalarGridSpec(
            num_scalar_prefetch=1,                     # idx -> SMEM
            grid=(NT_pad // tb,),
            in_specs=[
                pl.BlockSpec(memory_space=pl.ANY),     # table stays in HBM
            ],
            out_specs=pl.BlockSpec((tb, D), lambda b, idx: (b, 0)),
            scratch_shapes=[pltpu.SemaphoreType.DMA((_DMA_RING,))],
        ),
        compiler_params=pltpu.CompilerParams(
            dimension_semantics=("parallel",),         # v7x: shard blocks on 2 TCs
        ),
        cost_estimate=cost,
    )(idx, w_embed)

    if NT_pad != NT:
        out = out[:NT]
    return out.reshape(N, T, D)


def word_embedding_ref(x, w_embed):
    """Pure-JAX reference matching the PyTorch forward: W_embed[x]."""
    return w_embed[x]


if __name__ == "__main__":
    key = jax.random.PRNGKey(0)

    # --- Main case (matches the spec's scale): N=2, T=8, V=30, D=32 ---------
    N, T, V, D = 2, 8, 30, 32
    kw, kx, key = (*jax.random.split(key, 2), key)
    W_embed = jax.random.normal(kw, (V, D), dtype=jnp.float32) / jnp.sqrt(float(V))
    x = jax.random.randint(kx, (N, T), 0, V, dtype=jnp.int32)

    out = word_embedding_pallas(x, W_embed)
    jax.block_until_ready(out)
    assert out.shape == (N, T, D)
    assert out.dtype == W_embed.dtype
    assert jnp.array_equal(out, word_embedding_ref(x, W_embed))  # gather is exact

    # --- Multi-block + row-padded case: lane-dense D=128, 3 grid steps ------
    N2, T2, V2, D2 = 3, 7, 50, 128
    kw2, kx2 = jax.random.split(jax.random.PRNGKey(1))
    W2 = jax.random.normal(kw2, (V2, D2), dtype=jnp.float32) / jnp.sqrt(float(V2))
    x2 = jax.random.randint(kx2, (N2, T2), 0, V2, dtype=jnp.int32)
    out2 = word_embedding_pallas(x2, W2, tokens_per_block=8)
    jax.block_until_ready(out2)
    assert jnp.array_equal(out2, word_embedding_ref(x2, W2))

    print("KERNEL_OK")
</pallas_src>

<mosaic_0001>
module attributes {stable_mosaic.version = 11 : i64} {
  func.func @_embed_gather_kernel(%arg0: i32, %arg1: memref<16xi32, #tpu.memory_space<smem>>, %arg2: memref<30x32xf32, #tpu.memory_space<any>>, %arg3: memref<16x32xf32, #tpu.memory_space<vmem>>, %arg4: memref<8x!tpu.dma_semaphore, #tpu.memory_space<semaphore_mem>>) attributes {dimension_semantics = [#tpu.dimension_semantics<parallel>], iteration_bounds = array<i64: 1>, scalar_prefetch = 1 : i64, scratch_operands = 1 : i64, tpu.core_type = #tpu.core_type<tc>, window_params = [{}, {transform_indices = @transform_1, window_bounds = array<i64: 16, 32>}]} {
    %c16_i32 = arith.constant 16 : i32
    %0 = arith.muli %arg0, %c16_i32 : i32
    %c0_i32 = arith.constant 0 : i32
    %c8_i32 = arith.constant 8 : i32
    %1 = arith.addi %c0_i32, %c8_i32 : i32
    %c1_i32 = arith.constant 1 : i32
    scf.for %arg5 = %c0_i32 to %1 step %c1_i32  : i32 {
      %c1_i32_9 = arith.constant 1 : i32
      %4 = arith.muli %arg5, %c1_i32_9 : i32
      %c0_i32_10 = arith.constant 0 : i32
      %5 = arith.addi %c0_i32_10, %4 : i32
      %6 = arith.addi %0, %5 : i32
      %7 = arith.index_cast %6 : i32 to index
      %8 = memref.load %arg1[%7] : memref<16xi32, #tpu.memory_space<smem>>
      %c8_i32_11 = arith.constant 8 : i32
      %c0_i32_12 = arith.constant 0 : i32
      %9 = arith.cmpi eq, %c8_i32_11, %c0_i32_12 : i32
      %c1_i32_13 = arith.constant 1 : i32
      %10 = arith.select %9, %c1_i32_13, %c8_i32_11 : i32
      %11 = arith.remsi %5, %10 : i32
      %c0_i32_14 = arith.constant 0 : i32
      %12 = arith.cmpi ne, %11, %c0_i32_14 : i32
      %c0_i32_15 = arith.constant 0 : i32
      %13 = arith.cmpi slt, %11, %c0_i32_15 : i32
      %c0_i32_16 = arith.constant 0 : i32
      %14 = arith.cmpi slt, %10, %c0_i32_16 : i32
      %15 = arith.xori %13, %14 : i1
      %16 = arith.andi %15, %12 : i1
      %17 = arith.addi %11, %10 : i32
      %18 = arith.select %16, %17, %11 : i32
      %c0_i32_17 = arith.constant 0 : i32
      %19 = tpu.memref_slice %arg2[%8, %c0_i32_17] : memref<30x32xf32, #tpu.memory_space<any>> -> memref<1x32xf32, #tpu.memory_space<any>>
      %c0_i32_18 = arith.constant 0 : i32
      %20 = tpu.memref_slice %arg3[%5, %c0_i32_18] : memref<16x32xf32, #tpu.memory_space<vmem>> -> memref<1x32xf32, #tpu.memory_space<vmem>>
      %21 = tpu.memref_slice %arg4[%18] : memref<8x!tpu.dma_semaphore, #tpu.memory_space<semaphore_mem>> -> memref<1x!tpu.dma_semaphore, #tpu.memory_space<semaphore_mem>>
      %22 = tpu.memref_squeeze %21 : memref<1x!tpu.dma_semaphore, #tpu.memory_space<semaphore_mem>> -> memref<!tpu.dma_semaphore, #tpu.memory_space<semaphore_mem>>
      tpu.enqueue_dma source(%19 : memref<1x32xf32, #tpu.memory_space<any>>) target(%20 : memref<1x32xf32, #tpu.memory_space<vmem>>) target_semaphore(%22 : memref<!tpu.dma_semaphore, #tpu.memory_space<semaphore_mem>>)
    }
    %c8_i32_0 = arith.constant 8 : i32
    %c0_i32_1 = arith.constant 0 : i32
    %c8_i32_2 = arith.constant 8 : i32
    %2 = arith.addi %c0_i32_1, %c8_i32_2 : i32
    %c1_i32_3 = arith.constant 1 : i32
    scf.for %arg5 = %c0_i32_1 to %2 step %c1_i32_3  : i32 {
      %c1_i32_9 = arith.constant 1 : i32
      %4 = arith.muli %arg5, %c1_i32_9 : i32
      %c0_i32_10 = arith.constant 0 : i32
      %5 = arith.addi %c0_i32_10, %4 : i32
      %c8_i32_11 = arith.constant 8 : i32
      %c0_i32_12 = arith.constant 0 : i32
      %6 = arith.cmpi eq, %c8_i32_11, %c0_i32_12 : i32
      %c1_i32_13 = arith.constant 1 : i32
      %7 = arith.select %6, %c1_i32_13, %c8_i32_11 : i32
      %8 = arith.remsi %5, %7 : i32
      %c0_i32_14 = arith.constant 0 : i32
      %9 = arith.cmpi ne, %8, %c0_i32_14 : i32
      %c0_i32_15 = arith.constant 0 : i32
      %10 = arith.cmpi slt, %8, %c0_i32_15 : i32
      %c0_i32_16 = arith.constant 0 : i32
      %11 = arith.cmpi slt, %7, %c0_i32_16 : i32
      %12 = arith.xori %10, %11 : i1
      %13 = arith.andi %12, %9 : i1
      %14 = arith.addi %8, %7 : i32
      %15 = arith.select %13, %14, %8 : i32
      %c0_i32_17 = arith.constant 0 : i32
      %c0_i32_18 = arith.constant 0 : i32
      %16 = tpu.memref_slice %arg2[%c0_i32_17, %c0_i32_18] : memref<30x32xf32, #tpu.memory_space<any>> -> memref<1x32xf32, #tpu.memory_space<any>>
      %c0_i32_19 = arith.constant 0 : i32
      %17 = tpu.memref_slice %arg3[%5, %c0_i32_19] : memref<16x32xf32, #tpu.memory_space<vmem>> -> memref<1x32xf32, #tpu.memory_space<vmem>>
      %18 = tpu.memref_slice %arg4[%15] : memref<8x!tpu.dma_semaphore, #tpu.memory_space<semaphore_mem>> -> memref<1x!tpu.dma_semaphore, #tpu.memory_space<semaphore_mem>>
      %19 = tpu.memref_squeeze %18 : memref<1x!tpu.dma_semaphore, #tpu.memory_space<semaphore_mem>> -> memref<!tpu.dma_semaphore, #tpu.memory_space<semaphore_mem>>
      tpu.wait_dma2 semaphore(%19 : memref<!tpu.dma_semaphore, #tpu.memory_space<semaphore_mem>>) src(%16 : memref<1x32xf32, #tpu.memory_space<any>>) dst(%17 : memref<1x32xf32, #tpu.memory_space<vmem>>)
      %c8_i32_20 = arith.constant 8 : i32
      %20 = arith.addi %5, %c8_i32_20 : i32
      %21 = arith.addi %0, %20 : i32
      %22 = arith.index_cast %21 : i32 to index
      %23 = memref.load %arg1[%22] : memref<16xi32, #tpu.memory_space<smem>>
      %c8_i32_21 = arith.constant 8 : i32
      %c0_i32_22 = arith.constant 0 : i32
      %24 = arith.cmpi eq, %c8_i32_21, %c0_i32_22 : i32
      %c1_i32_23 = arith.constant 1 : i32
      %25 = arith.select %24, %c1_i32_23, %c8_i32_21 : i32
      %26 = arith.remsi %20, %25 : i32
      %c0_i32_24 = arith.constant 0 : i32
      %27 = arith.cmpi ne, %26, %c0_i32_24 : i32
      %c0_i32_25 = arith.constant 0 : i32
      %28 = arith.cmpi slt, %26, %c0_i32_25 : i32
      %c0_i32_26 = arith.constant 0 : i32
      %29 = arith.cmpi slt, %25, %c0_i32_26 : i32
      %30 = arith.xori %28, %29 : i1
      %31 = arith.andi %30, %27 : i1
      %32 = arith.addi %26, %25 : i32
      %33 = arith.select %31, %32, %26 : i32
      %c0_i32_27 = arith.constant 0 : i32
      %34 = tpu.memref_slice %arg2[%23, %c0_i32_27] : memref<30x32xf32, #tpu.memory_space<any>> -> memref<1x32xf32, #tpu.memory_space<any>>
      %c0_i32_28 = arith.constant 0 : i32
      %35 = tpu.memref_slice %arg3[%20, %c0_i32_28] : memref<16x32xf32, #tpu.memory_space<vmem>> -> memref<1x32xf32, #tpu.memory_space<vmem>>
      %36 = tpu.memref_slice %arg4[%33] : memref<8x!tpu.dma_semaphore, #tpu.memory_space<semaphore_mem>> -> memref<1x!tpu.dma_semaphore, #tpu.memory_space<semaphore_mem>>
      %37 = tpu.memref_squeeze %36 : memref<1x!tpu.dma_semaphore, #tpu.memory_space<semaphore_mem>> -> memref<!tpu.dma_semaphore, #tpu.memory_space<semaphore_mem>>
      tpu.enqueue_dma source(%34 : memref<1x32xf32, #tpu.memory_space<any>>) target(%35 : memref<1x32xf32, #tpu.memory_space<vmem>>) target_semaphore(%37 : memref<!tpu.dma_semaphore, #tpu.memory_space<semaphore_mem>>)
    }
    %c8_i32_4 = arith.constant 8 : i32
    %c0_i32_5 = arith.constant 0 : i32
    %c8_i32_6 = arith.constant 8 : i32
    %3 = arith.addi %c0_i32_5, %c8_i32_6 : i32
    %c1_i32_7 = arith.constant 1 : i32
    scf.for %arg5 = %c0_i32_5 to %3 step %c1_i32_7  : i32 {
      %c1_i32_9 = arith.constant 1 : i32
      %4 = arith.muli %arg5, %c1_i32_9 : i32
      %c8_i32_10 = arith.constant 8 : i32
      %5 = arith.addi %c8_i32_10, %4 : i32
      %c8_i32_11 = arith.constant 8 : i32
      %c0_i32_12 = arith.constant 0 : i32
      %6 = arith.cmpi eq, %c8_i32_11, %c0_i32_12 : i32
      %c1_i32_13 = arith.constant 1 : i32
      %7 = arith.select %6, %c1_i32_13, %c8_i32_11 : i32
      %8 = arith.remsi %5, %7 : i32
      %c0_i32_14 = arith.constant 0 : i32
      %9 = arith.cmpi ne, %8, %c0_i32_14 : i32
      %c0_i32_15 = arith.constant 0 : i32
      %10 = arith.cmpi slt, %8, %c0_i32_15 : i32
      %c0_i32_16 = arith.constant 0 : i32
      %11 = arith.cmpi slt, %7, %c0_i32_16 : i32
      %12 = arith.xori %10, %11 : i1
      %13 = arith.andi %12, %9 : i1
      %14 = arith.addi %8, %7 : i32
      %15 = arith.select %13, %14, %8 : i32
      %c0_i32_17 = arith.constant 0 : i32
      %c0_i32_18 = arith.constant 0 : i32
      %16 = tpu.memref_slice %arg2[%c0_i32_17, %c0_i32_18] : memref<30x32xf32, #tpu.memory_space<any>> -> memref<1x32xf32, #tpu.memory_space<any>>
      %c0_i32_19 = arith.constant 0 : i32
      %17 = tpu.memref_slice %arg3[%5, %c0_i32_19] : memref<16x32xf32, #tpu.memory_space<vmem>> -> memref<1x32xf32, #tpu.memory_space<vmem>>
      %18 = tpu.memref_slice %arg4[%15] : memref<8x!tpu.dma_semaphore, #tpu.memory_space<semaphore_mem>> -> memref<1x!tpu.dma_semaphore, #tpu.memory_space<semaphore_mem>>
      %19 = tpu.memref_squeeze %18 : memref<1x!tpu.dma_semaphore, #tpu.memory_space<semaphore_mem>> -> memref<!tpu.dma_semaphore, #tpu.memory_space<semaphore_mem>>
      tpu.wait_dma2 semaphore(%19 : memref<!tpu.dma_semaphore, #tpu.memory_space<semaphore_mem>>) src(%16 : memref<1x32xf32, #tpu.memory_space<any>>) dst(%17 : memref<1x32xf32, #tpu.memory_space<vmem>>)
    }
    %c8_i32_8 = arith.constant 8 : i32
    return
  }
  func.func @transform_1(%arg0: i32, %arg1: memref<16xi32, #tpu.memory_space<smem>>) -> (i32, i32) {
    %c0_i32 = arith.constant 0 : i32
    %c0_i32_0 = arith.constant 0 : i32
    return %arg0, %c0_i32 : i32, i32
  }
}

</mosaic_0001>

<bundles_post_ra>
// kernel: word_embedding_pallas.1
= control target key start
LH: loop header
LB: loop body
LE: loop exit
PB: predicated region body
PF: predicated region fallthrough
CT: control target
= control target key end

     0   :  { %s390_s12 = smov [#allocation4]   ;;  %s472_s0 = inlined_call_operand.vmem [shape: s32[16], index: 0, kind: input, shape index: {}]   ;;  %s473_s1 = inlined_call_operand.hbm [shape: f32[30,32], index: 1, kind: input, shape index: {}]   ;;  %s474_s2 = inlined_call_operand.hbm [shape: f32[16,32], index: 2, kind: output, shape index: {}]  }
   0x1   :  { %s8_s11 = sshll.u32 %s472_s0, 4  ;;  %s9_s11 = int_to_ptr.vmem [resolvable:$true] %s8_s11 }
   0x2   :  { %11 = dma.vmem_to_smem %s9_s11, 16, %s390_s12, [#allocation3] }
   0x3   :  { %370 = dma.done.wait [#allocation3], 16 }
   0x4   :  { %371 = vsyncadd [#allocation3], 4294967280 }
   0x5   :  { %14 = sfence }
   0x6   :  { %15 = vsyncpa [#allocation6], 0  ;;  %s413_s13 = smov 0  }
   0x7 LB: > { %s24_s0 = sld [smem:[#allocation4 + %s380_s13]]  ;;  %p25_p0 = scmp.lt.s32.totalorder %s380_s13, 0  ;;  %s380_s13 = sphi %s413_s13, %s22_s13  }
   0x8   : > { %s26_s14 = ssub.s32 0, %s380_s13  ;;  %s38_s18 = scalar_lea.vmem [#allocation5], %s380_s13 }
   0x9   : > { %s226_s15 = smin.u32 %s380_s13, %s26_s14  ;;  %s423_s19 = sshll.u32 %s38_s18, 4  ;;  %s50_s19 = int_to_ptr.vmem [resolvable:$true] %s423_s19 }
   0xa   : > { %s28_s16 = sand.u32 7, %s226_s15   ;;  %s290_s30 = scalar_lea.hbm %s473_s1, 32 }
   0xb   : > { %s29_s17 = ssub.s32 0, %s28_s16 }
   0xc   : > { %s476_s17 = smov (!%p25_p0, %s29_s17), %s28_s16 }
   0xd   : > { %s37_s22 = scalar_lea.hbm %s473_s1, %s24_s0  ;;  %p228_p1 = scmp.lt.s32.totalorder %s476_s17, 0 }
   0xe   : > { %s35_s23 = sadd.s32 8, %s476_s17  ;;  %s47_s24 = sshll.u32 %s37_s22, 4  ;;  %s48_s24 = int_to_ptr.hbm [resolvable:$true] %s47_s24 }
   0xf   : > { %s478_s23 = smov (!%p228_p1, %s35_s23), %s476_s17  ;;  %s286_s26 = sshra.s32 %s48_s24, 4  ;;  %s287_s26 = int_to_ptr.hbm [resolvable:$true] %s286_s26 }
  0x10   : > { %s39_s25 = scalar_lea.sflag [#allocation2], %s478_s23  ;;  %s288_s27 = scalar_lea.hbm %s287_s26, 1 }
  0x11   : > { %p289_p2 = scmp.ne.s32.totalorder %s287_s26, %s288_s27  ;;  %p291_p3 = scmp.lt.s32.totalorder %s287_s26, %s473_s1 }
  0x12   : > { %p292_p4 = scmp.lt.s32.totalorder %s290_s30, %s288_s27 }
  0x14   : > { %p293_p5 = por %p292_p4, %p291_p3 }
  0x16   : > { %p294_p6 = pnand %p293_p5, %p289_p2 }
  0x18   : > { %297 = shalt.err (!%p294_p6)  }
  0x19   : > { %s298_s7 = sshra.s32 %s50_s19, 4  ;;  %s391_s9 = smov [#allocation5]   ;;  %s299_s7 = int_to_ptr.vmem [resolvable:$true] %s298_s7 }
  0x1a   : > { %s300_s8 = scalar_lea.vmem %s299_s7, 1  ;;  %s439_s10 = scalar_lea.vmem %s391_s9, 16 }
  0x1b   : > { %p301_p7 = scmp.ne.s32.totalorder %s299_s7, %s300_s8  ;;  %p303_p8 = scmp.lt.s32.totalorder %s299_s7, [#allocation5] }
  0x1c   : > { %p304_p9 = scmp.lt.s32.totalorder %s439_s10, %s300_s8 }
  0x1e   : > { %p305_p10 = por %p304_p9, %p303_p8 }
  0x20   : > { %p306_p11 = pnand %p305_p10, %p301_p7 }
  0x22   : > { %309 = shalt.err (!%p306_p11)  }
  0x23   : > { %52 = dma.hbm_to_vmem [thread:$0]  %s48_s24, 16, %s50_s19, %s39_s25 }
  0x24   : > { %s22_s13 = sadd.s32 1, %s380_s13  }
  0x25   : > { %p19_p12 = scmp.ge.s32.totalorder %s22_s13, 8  }
  0x26   :  { %s445_s11 = smov (%p19_p12), 0  }
  0x27   :  { %21 = sbr.rel (!%p19_p12) target bundleno = 7 (0x7), region = 64 }
  0x2c LB: > { %p59_p13 = scmp.lt.s32.totalorder %s384_s11, 0  ;;  %s60_s12 = ssub.s32 0, %s384_s11  ;;  %s384_s11 = sphi %s445_s11, %s58_s11  }
  0x2d   : > { %s229_s0 = smin.u32 %s384_s11, %s60_s12 }
  0x2e   : > { %s62_s14 = sand.u32 7, %s229_s0  }
  0x2f   : > { %s63_s15 = ssub.s32 0, %s62_s14 }
  0x30   : > { %s480_s15 = smov (!%p59_p13, %s63_s15), %s62_s14 }
  0x31   : > { %p231_p0 = scmp.lt.s32.totalorder %s480_s15, 0  ;;  %s69_s16 = sadd.s32 8, %s480_s15 }
  0x33   : > { %s482_s16 = smov (!%p231_p0, %s69_s16), %s480_s15 }
  0x34   : > { %s71_s13 = scalar_lea.sflag [#allocation2], %s482_s16 }
  0x35   : > { %372 = dma.done.wait %s71_s13, 16 }
  0x36   : > { %373 = vsyncadd %s71_s13, 4294967280  ;;  %s75_s17 = sadd.s32 8, %s384_s11  ;;  %s207_s20 = scalar_lea.vmem [#allocation5], %s384_s11 }
  0x37   : > { %s77_s18 = sld [smem:[#allocation4 + %s75_s17]]  ;;  %p78_p1 = scmp.lt.s32.totalorder %s75_s17, 0 }
  0x38   : > { %s79_s19 = ssub.s32 0, %s75_s17  ;;  %s208_s21 = scalar_lea.vmem %s207_s20, 8 [#allocation5] }
  0x39   : > { %s232_s22 = smin.u32 %s79_s19, %s75_s17  ;;  %s102_s24 = sshll.u32 %s208_s21, 4  ;;  %s103_s24 = int_to_ptr.vmem [resolvable:$true] %s102_s24 }
  0x3a   : > { %s81_s23 = sand.u32 7, %s232_s22  }
  0x3b   : > { %s82_s25 = ssub.s32 0, %s81_s23 }
  0x3c   : > { %s484_s25 = smov (!%p78_p1, %s82_s25), %s81_s23 }
  0x3d   : > { %s90_s28 = scalar_lea.hbm %s473_s1, %s77_s18  ;;  %p234_p2 = scmp.lt.s32.totalorder %s484_s25, 0 }
  0x3e   : > { %s100_s29 = sshll.u32 %s90_s28, 4  ;;  %s88_s3 = sadd.s32 8, %s484_s25  ;;  %s101_s29 = int_to_ptr.hbm [resolvable:$true] %s100_s29 }
  0x3f   : > { %s486_s3 = smov (!%p234_p2, %s88_s3), %s484_s25  ;;  %s310_s5 = sshra.s32 %s101_s29, 4  ;;  %s311_s5 = int_to_ptr.hbm [resolvable:$true] %s310_s5 }
  0x40   : > { %s92_s4 = scalar_lea.sflag [#allocation2], %s486_s3  ;;  %s312_s6 = scalar_lea.hbm %s311_s5, 1 }
  0x41   : > { %p313_p3 = scmp.ne.s32.totalorder %s311_s5, %s312_s6  ;;  %p315_p4 = scmp.lt.s32.totalorder %s311_s5, %s473_s1 }
  0x42   : > { %p316_p5 = scmp.lt.s32.totalorder %s290_s30, %s312_s6 }
  0x44   : > { %p317_p6 = por %p316_p5, %p315_p4 }
  0x46   : > { %p318_p7 = pnand %p317_p6, %p313_p3 }
  0x48   : > { %321 = shalt.err (!%p318_p7)  }
  0x49   : > { %s322_s0 = sshra.s32 %s103_s24, 4  ;;  %s323_s0 = int_to_ptr.vmem [resolvable:$true] %s322_s0 }
  0x4a   : > { %s324_s14 = scalar_lea.vmem %s323_s0, 1  ;;  %p327_p9 = scmp.lt.s32.totalorder %s323_s0, [#allocation5] }
  0x4b   : > { %p325_p8 = scmp.ne.s32.totalorder %s323_s0, %s324_s14  ;;  %p328_p10 = scmp.lt.s32.totalorder %s439_s10, %s324_s14 }
  0x4d   : > { %p329_p11 = por %p328_p10, %p327_p9 }
  0x4f   : > { %p330_p12 = pnand %p329_p11, %p325_p8 }
  0x51   : > { %333 = shalt.err (!%p330_p12)  }
  0x52   : > { %105 = dma.hbm_to_vmem [thread:$0]  %s101_s29, 16, %s103_s24, %s92_s4 }
  0x53   : > { %s58_s11 = sadd.s32 1, %s384_s11  }
  0x54   : > { %p55_p13 = scmp.ge.s32.totalorder %s58_s11, 8  }
  0x55   :  { %s386_s15 = smov (%p55_p13), 0  }
  0x56   :  { %57 = sbr.rel (!%p55_p13) target bundleno = 44 (0x2c), region = 75 }
  0x5b LB: > { %s112_s16 = sadd.s32 8, %s388_s15  ;;  %s388_s15 = sphi %s386_s15, %s111_s15  }
  0x5c   : > { %p113_p0 = scmp.lt.s32.totalorder %s112_s16, 0  ;;  %s114_s13 = ssub.s32 0, %s112_s16 }
  0x5d   : > { %s235_s17 = smin.u32 %s114_s13, %s112_s16 }
  0x5e   : > { %s116_s18 = sand.u32 7, %s235_s17  }
  0x5f   : > { %s117_s19 = ssub.s32 0, %s116_s18 }
  0x60   : > { %s488_s19 = smov (!%p113_p0, %s117_s19), %s116_s18 }
  0x61   : > { %p237_p1 = scmp.lt.s32.totalorder %s488_s19, 0  ;;  %s123_s20 = sadd.s32 8, %s488_s19 }
  0x63   : > { %s490_s20 = smov (!%p237_p1, %s123_s20), %s488_s19 }
  0x64   : > { %s125_s21 = scalar_lea.sflag [#allocation2], %s490_s20 }
  0x65   : > { %374 = dma.done.wait %s125_s21, 16 }
  0x66   : > { %375 = vsyncadd %s125_s21, 4294967280  ;;  %s111_s15 = sadd.s32 1, %s388_s15  }
  0x67   : > { %p108_p2 = scmp.ge.s32.totalorder %s111_s15, 8  }
  0x68   :  { %s135_s10 = sshll.u32 (%p108_p2), %s474_s2, 4  ;;  %s392_s11 = smov (%p108_p2), [#allocation5]   ;;  %s136_s10 = int_to_ptr.hbm [resolvable:$true] %s135_s10 }
  0x69   :  { %110 = sbr.rel (!%p108_p2) target bundleno = 91 (0x5b), region = 86  ;;  %s133_s22 = sshll.u32 (%p108_p2), %s392_s11, 4  ;;  %s134_s22 = int_to_ptr.vmem [resolvable:$true] %s133_s22 }
  0x6a   :  { %s393_s23 = smov (%p108_p2), 128   ;;  %s394_s24 = smov (%p108_p2), 8  }
  0x6b   :  { %141 = dma.vmem_to_hbm [thread:$0]  (%p108_p2), %s134_s22, 256, %s136_s10, [#allocation6], %s393_s23, %s393_s23, %s394_s24  }
  0x6e   :  { %376 = dma.done.wait [#allocation6], 256  }
  0x6f   :  { %377 = vsyncadd [#allocation6], 4294967040 }
  0x70   :  { %146 = vsyncpa [#allocation6], 1 }
  0x71   :  { %147 = vsyncmov [#allocation2] }
  0x74   :  { %s148_s25 = vpop.sfrf %147 }
  0x75   :  { %p238_p3 = scmp.ne.s32.totalorder %s148_s25, 0 }
  0x77   :  { %152 = shalt.err (%p238_p3)  }
  0x78   :  { %154 = vsyncmov [#allocation2 + $0x1] }
  0x7b   :  { %s155_s26 = vpop.sfrf %154 }
  0x7c   :  { %p239_p4 = scmp.ne.s32.totalorder %s155_s26, 0 }
  0x7e   :  { %159 = shalt.err (%p239_p4)  }
  0x7f   :  { %161 = vsyncmov [#allocation2 + $0x2] }
  0x82   :  { %s162_s2 = vpop.sfrf %161 }
  0x83   :  { %p240_p5 = scmp.ne.s32.totalorder %s162_s2, 0 }
  0x85   :  { %166 = shalt.err (%p240_p5)  }
  0x86   :  { %168 = vsyncmov [#allocation2 + $0x3] }
  0x89   :  { %s169_s27 = vpop.sfrf %168 }
  0x8a   :  { %p241_p6 = scmp.ne.s32.totalorder %s169_s27, 0 }
  0x8c   :  { %173 = shalt.err (%p241_p6)  }
  0x8d   :  { %175 = vsyncmov [#allocation2 + $0x4] }
  0x90   :  { %s176_s28 = vpop.sfrf %175 }
  0x91   :  { %p242_p7 = scmp.ne.s32.totalorder %s176_s28, 0 }
  0x93   :  { %180 = shalt.err (%p242_p7)  }
  0x94   :  { %182 = vsyncmov [#allocation2 + $0x5] }
  0x97   :  { %s183_s29 = vpop.sfrf %182 }
  0x98   :  { %p243_p8 = scmp.ne.s32.totalorder %s183_s29, 0 }
  0x9a   :  { %187 = shalt.err (%p243_p8)  }
  0x9b   :  { %189 = vsyncmov [#allocation2 + $0x6] }
  0x9e   :  { %s190_s3 = vpop.sfrf %189 }
  0x9f   :  { %p244_p9 = scmp.ne.s32.totalorder %s190_s3, 0 }
  0xa1   :  { %194 = shalt.err (%p244_p9)  }
  0xa2   :  { %196 = vsyncmov [#allocation2 + $0x7] }
  0xa5   :  { %s197_s4 = vpop.sfrf %196 }
  0xa6   :  { %p245_p10 = scmp.ne.s32.totalorder %s197_s4, 0 }
  0xa8   :  { %201 = shalt.err (%p245_p10)  }

</bundles_post_ra>
